<compile_context>
chip_gen: v7x
topology: tpu7x:2x2x1
jax: 0.10.0
libtpu: 0.0.40
codegen_flags: <defaults>
</compile_context>

<pallas_src>
import functools

import jax
import jax.numpy as jnp
import numpy as np
from jax.experimental import pallas as pl
from jax.experimental.pallas import tpu as pltpu


def _round_up(x, m):
    return (x + m - 1) // m * m


# ---------------------------------------------------------------------------
# Fused single-shot kernel (A resident in VMEM) for small/medium graphs:
#   O = A @ (relu(A @ XW1 + b1) @ W2p) + b2p
# ---------------------------------------------------------------------------
def gcn_fused_kernel(a_ref, xw1_ref, b1_ref, w2_ref, b2_ref, o_ref):
    a = a_ref[...]
    h = jnp.dot(a, xw1_ref[...], preferred_element_type=jnp.float32) + b1_ref[...]
    h = jnp.maximum(h, 0.0)
    z = jnp.dot(h.astype(jnp.bfloat16), w2_ref[...],
                preferred_element_type=jnp.float32)
    o_ref[...] = jnp.dot(a, z.astype(jnp.bfloat16),
                         preferred_element_type=jnp.float32) + b2_ref[...]


# ---------------------------------------------------------------------------
# Pass 1 (large graphs): Z = relu(A @ XW1 + b1) @ W2p
# Row-tiled K-reduction over A columns; lane-dense (tm, hid) f32 accumulator.
# ---------------------------------------------------------------------------
def gcn_pass1_kernel(a_ref, xw1_ref, b1_ref, w2_ref, z_ref, acc_ref):
    k = pl.program_id(1)

    @pl.when(k == 0)
    def _():
        acc_ref[...] = jnp.zeros_like(acc_ref)

    acc_ref[...] += jnp.dot(a_ref[...], xw1_ref[...],
                            preferred_element_type=jnp.float32)

    @pl.when(k == pl.num_programs(1) - 1)
    def _():
        h = jnp.maximum(acc_ref[...] + b1_ref[...], 0.0)
        z = jnp.dot(h.astype(jnp.bfloat16), w2_ref[...],
                    preferred_element_type=jnp.float32)
        z_ref[...] = z.astype(z_ref.dtype)


# ---------------------------------------------------------------------------
# Pass 2 (large graphs): O = A @ Z + b2p
# z_resident=True keeps the whole Z in VMEM (constant-index BlockSpec, DMA'd
# once) and slices the K-tile with pl.ds instead of re-reading it every step.
# ---------------------------------------------------------------------------
def gcn_pass2_kernel(a_ref, z_ref, b2_ref, o_ref, acc_ref, *, tk, z_resident):
    k = pl.program_id(1)

    @pl.when(k == 0)
    def _():
        acc_ref[...] = jnp.zeros_like(acc_ref)

    if z_resident:
        start = pl.multiple_of(k * tk, tk)
        z_tile = z_ref[pl.ds(start, tk), :]
    else:
        z_tile = z_ref[...]

    acc_ref[...] += jnp.dot(a_ref[...], z_tile,
                            preferred_element_type=jnp.float32)

    @pl.when(k == pl.num_programs(1) - 1)
    def _():
        o_ref[...] = acc_ref[...] + b2_ref[...]


def normalized_adjacency(edge_index, num_nodes, n_pad=None):
    """Dense D^-1/2 (A + I) D^-1/2 built directly at the padded size, in bf16.

    Padded rows/cols have no edges, no self-loop and zero degree, so they are
    all-zero and never contaminate the real region. Scatter-ADD so duplicate
    edges accumulate, matching PyG GCNConv's scatter-add aggregation.
    """
    if n_pad is None:
        n_pad = num_nodes
    src, dst = edge_index[0], edge_index[1]
    a = jnp.zeros((n_pad, n_pad), jnp.float32)
    a = a.at[dst, src].add(1.0)                        # aggregate src -> dst
    self_loop = (jnp.arange(n_pad) < num_nodes).astype(jnp.float32)
    a = a + jnp.diag(self_loop)                        # self-loops, real nodes only
    deg = jnp.sum(a, axis=1)
    d_inv_sqrt = jnp.where(deg > 0, 1.0 / jnp.sqrt(deg), 0.0)
    return (d_inv_sqrt[:, None] * a * d_inv_sqrt[None, :]).astype(jnp.bfloat16)


def gcn_forward(x, edge_index, w1, b1, w2, b2, *, max_fused_nodes=2048):
    n, in_c = x.shape
    hid = w1.shape[1]
    out_c = w2.shape[1]
    out_p = _round_up(out_c, 128)              # lane-dense output slab

    fused = n <= max_fused_nodes
    if fused:
        # 16-row alignment (bf16 sublane pack); lane-dense A cols when n > 128.
        n_pad = _round_up(n, 16) if n <= 128 else _round_up(n, 128)
    else:
        # 512-tiles sit near the HBM roofline; cap tm so there are >= 2 row
        # tiles for megacore ("parallel") sharding on v7x.
        n_pad = _round_up(n, 512)
        tk = 512
        tm = 512 if n_pad // 512 >= 2 else 256

    # Normalized adjacency built directly at the padded size in bf16
    # (no separate f32 pad + cast sweep over A).
    a_p = normalized_adjacency(edge_index, n, n_pad)

    # Hoist the tiny X @ W1 ((n,16) x (16,128)) to the wrapper: the kernel
    # then accumulates A @ XW1 into a lane-dense (tm, hid) accumulator.
    xw1 = jnp.dot(x.astype(jnp.float32), w1.astype(jnp.float32))
    xw1_p = jnp.zeros((n_pad, hid), jnp.bfloat16).at[:n, :].set(
        xw1.astype(jnp.bfloat16))

    b1_f = b1.reshape(1, hid).astype(jnp.float32)
    w2_p = jnp.zeros((hid, out_p), jnp.bfloat16).at[:, :out_c].set(
        w2.astype(jnp.bfloat16))
    b2_p = jnp.zeros((1, out_p), jnp.float32).at[:, :out_c].set(
        b2.reshape(1, out_c).astype(jnp.float32))

    vmem_limit = 48 * 1024 * 1024   # fits v7x's 64 MiB physical VMEM

    if fused:
        o_p = pl.pallas_call(
            gcn_fused_kernel,
            out_shape=jax.ShapeDtypeStruct((n_pad, out_p), jnp.float32),
            grid=(1,),
            in_specs=[
                pl.BlockSpec((n_pad, n_pad), lambda i: (0, 0)),   # A (resident)
                pl.BlockSpec((n_pad, hid), lambda i: (0, 0)),     # XW1 (resident)
                pl.BlockSpec((1, hid), lambda i: (0, 0)),         # b1
                pl.BlockSpec((hid, out_p), lambda i: (0, 0)),     # W2 padded
                pl.BlockSpec((1, out_p), lambda i: (0, 0)),       # b2 padded
            ],
            out_specs=pl.BlockSpec((n_pad, out_p), lambda i: (0, 0)),
            compiler_params=pltpu.CompilerParams(
                dimension_semantics=("arbitrary",),
                vmem_limit_bytes=vmem_limit),
        )(a_p, xw1_p, b1_f, w2_p, b2_p)
        return o_p[:n, :out_c]

    grid = (n_pad // tm, n_pad // tk)
    cparams = pltpu.CompilerParams(
        dimension_semantics=("parallel", "arbitrary"),
        vmem_limit_bytes=vmem_limit)

    # ---- Pass 1: Z = relu(A @ XW1 + b1) @ W2p -------------------------------
    z = pl.pallas_call(
        gcn_pass1_kernel,
        out_shape=jax.ShapeDtypeStruct((n_pad, out_p), jnp.bfloat16),
        grid=grid,
        in_specs=[
            pl.BlockSpec((tm, tk), lambda i, k: (i, k)),      # A row strip / K tile
            pl.BlockSpec((tk, hid), lambda i, k: (k, 0)),     # XW1 K-tile
            pl.BlockSpec((1, hid), lambda i, k: (0, 0)),      # b1 (resident)
            pl.BlockSpec((hid, out_p), lambda i, k: (0, 0)),  # W2 padded (resident)
        ],
        out_specs=pl.BlockSpec((tm, out_p), lambda i, k: (i, 0)),
        scratch_shapes=[pltpu.VMEM((tm, hid), jnp.float32)],
        compiler_params=cparams,
    )(a_p, xw1_p, b1_f, w2_p)

    # ---- Pass 2: O = A @ Z + b2p --------------------------------------------
    # Keep Z resident in VMEM unless its double-buffered bf16 slab gets large.
    z_resident = (2 * n_pad * out_p * 2) <= 24 * 1024 * 1024
    if z_resident:
        z_spec = pl.BlockSpec((n_pad, out_p), lambda i, k: (0, 0))
    else:
        z_spec = pl.BlockSpec((tk, out_p), lambda i, k: (k, 0))

    o_p = pl.pallas_call(
        functools.partial(gcn_pass2_kernel, tk=tk, z_resident=z_resident),
        out_shape=jax.ShapeDtypeStruct((n_pad, out_p), jnp.float32),
        grid=grid,
        in_specs=[
            pl.BlockSpec((tm, tk), lambda i, k: (i, k)),      # A row strip / K tile
            z_spec,                                           # Z (resident or K-tiled)
            pl.BlockSpec((1, out_p), lambda i, k: (0, 0)),    # b2 padded (resident)
        ],
        out_specs=pl.BlockSpec((tm, out_p), lambda i, k: (i, 0)),
        scratch_shapes=[pltpu.VMEM((tm, out_p), jnp.float32)],
        compiler_params=cparams,
    )(a_p, z, b2_p)

    return o_p[:n, :out_c]


def gcn_reference(a_norm_f32, x, w1, b1, w2, b2):
    """f32 math on the same bf16-rounded A / XW1 / W2 the kernel consumes."""
    xw1 = jnp.dot(x.astype(jnp.float32), w1.astype(jnp.float32))
    xw1 = xw1.astype(jnp.bfloat16).astype(jnp.float32)
    w2f = w2.astype(jnp.bfloat16).astype(jnp.float32)
    h = jax.nn.relu(a_norm_f32 @ xw1 + b1)
    return a_norm_f32 @ (h @ w2f) + b2


if __name__ == "__main__":
    IN_C = 16        # in_channels
    HID = 128        # GCNConv hidden size (fixed at 128 in the module)
    OUT_C = 8        # out_channels

    key = jax.random.PRNGKey(0)
    k_x, k_e, k_w1, k_w2, k_x2, k_e2 = jax.random.split(key, 6)

    # Deterministic glorot-like weights, zero biases (PyG GCNConv default init).
    w1 = jax.random.normal(k_w1, (IN_C, HID), jnp.float32) * jnp.sqrt(
        2.0 / (IN_C + HID))
    b1 = jnp.zeros((1, HID), jnp.float32)
    w2 = jax.random.normal(k_w2, (HID, OUT_C), jnp.float32) * jnp.sqrt(
        2.0 / (HID + OUT_C))
    b2 = jnp.zeros((1, OUT_C), jnp.float32)

    def run_case(n, e, kx, ke, max_fused_nodes):
        x = jax.random.normal(kx, (n, IN_C), jnp.float32)
        edge_index = jax.random.randint(ke, (2, e), 0, n, jnp.int32)
        out = jax.block_until_ready(
            gcn_forward(x, edge_index, w1, b1, w2, b2,
                        max_fused_nodes=max_fused_nodes))
        a_bf = normalized_adjacency(edge_index, n)        # (n, n) bf16
        ref = jax.block_until_ready(
            gcn_reference(a_bf.astype(jnp.float32), x, w1, b1, w2, b2))
        # bf16 operands / intermediates -> bf16-level tolerance vs f32 math.
        np.testing.assert_allclose(np.asarray(out), np.asarray(ref),
                                   rtol=5e-2, atol=5e-2)

    # Small graph -> fused single-shot kernel (A resident in VMEM, one launch).
    run_case(32, 64, k_x, k_e, max_fused_nodes=2048)
    # Force the tiled two-pass path (row-tiled K-reduction, Z resident in VMEM).
    run_case(300, 900, k_x2, k_e2, max_fused_nodes=0)

    # TODO(synk): dense N x N adjacency from edge_index is O(N^2); a truly
    # sparse (CSR/segment) aggregation is outside this dense-kernel design.
    print("KERNEL_OK")
</pallas_src>

<mosaic_0001>
module attributes {stable_mosaic.version = 11 : i64} {
  func.func @gcn_fused_kernel(%arg0: i32, %arg1: memref<32x32xbf16, #tpu.memory_space<vmem>>, %arg2: memref<32x128xbf16, #tpu.memory_space<vmem>>, %arg3: memref<1x128xf32, #tpu.memory_space<vmem>>, %arg4: memref<128x128xbf16, #tpu.memory_space<vmem>>, %arg5: memref<1x128xf32, #tpu.memory_space<vmem>>, %arg6: memref<32x128xf32, #tpu.memory_space<vmem>>) attributes {dimension_semantics = [#tpu.dimension_semantics<arbitrary>], iteration_bounds = array<i64: 1>, scalar_prefetch = 0 : i64, scratch_operands = 0 : i64, tpu.core_type = #tpu.core_type<tc>, window_params = [{pipeline_mode = #tpu.pipeline_mode<synchronous>, transform_indices = @transform_0, window_bounds = array<i64: 32, 32>}, {pipeline_mode = #tpu.pipeline_mode<synchronous>, transform_indices = @transform_1, window_bounds = array<i64: 32, 128>}, {pipeline_mode = #tpu.pipeline_mode<synchronous>, transform_indices = @transform_2, window_bounds = array<i64: 1, 128>}, {pipeline_mode = #tpu.pipeline_mode<synchronous>, transform_indices = @transform_3, window_bounds = array<i64: 128, 128>}, {pipeline_mode = #tpu.pipeline_mode<synchronous>, transform_indices = @transform_4, window_bounds = array<i64: 1, 128>}, {pipeline_mode = #tpu.pipeline_mode<synchronous>, transform_indices = @transform_5, window_bounds = array<i64: 32, 128>}]} {
    %c0 = arith.constant 0 : index
    %c0_0 = arith.constant 0 : index
    %0 = vector.load %arg1[%c0, %c0_0] : memref<32x32xbf16, #tpu.memory_space<vmem>>, vector<32x32xbf16>
    %c0_1 = arith.constant 0 : index
    %c0_2 = arith.constant 0 : index
    %1 = vector.load %arg2[%c0_1, %c0_2] : memref<32x128xbf16, #tpu.memory_space<vmem>>, vector<32x128xbf16>
    %cst = arith.constant dense<0.000000e+00> : vector<32x128xf32>
    %2 = tpu.matmul %0, %1, %cst {dimension_numbers = #tpu.dot_dimension_numbers<[1], [0], [0], [1], [0, 0, 1, 1], [], []>} : vector<32x32xbf16>, vector<32x128xbf16>, vector<32x128xf32> -> vector<32x128xf32>
    %c0_3 = arith.constant 0 : index
    %c0_4 = arith.constant 0 : index
    %3 = vector.load %arg3[%c0_3, %c0_4] : memref<1x128xf32, #tpu.memory_space<vmem>>, vector<1x128xf32>
    %4 = vector.broadcast %3 : vector<1x128xf32> to vector<32x128xf32>
    %5 = arith.addf %2, %4 : vector<32x128xf32>
    %cst_5 = arith.constant 0.000000e+00 : f32
    %6 = vector.broadcast %cst_5 : f32 to vector<32x128xf32>
    %7 = arith.maximumf %5, %6 : vector<32x128xf32>
    %8 = arith.truncf %7 : vector<32x128xf32> to vector<32x128xbf16>
    %c0_6 = arith.constant 0 : index
    %c0_7 = arith.constant 0 : index
    %9 = vector.load %arg4[%c0_6, %c0_7] : memref<128x128xbf16, #tpu.memory_space<vmem>>, vector<128x128xbf16>
    %cst_8 = arith.constant dense<0.000000e+00> : vector<32x128xf32>
    %10 = tpu.matmul %8, %9, %cst_8 {dimension_numbers = #tpu.dot_dimension_numbers<[1], [0], [0], [1], [0, 0, 1, 1], [], []>} : vector<32x128xbf16>, vector<128x128xbf16>, vector<32x128xf32> -> vector<32x128xf32>
    %11 = arith.truncf %10 : vector<32x128xf32> to vector<32x128xbf16>
    %cst_9 = arith.constant dense<0.000000e+00> : vector<32x128xf32>
    %12 = tpu.matmul %0, %11, %cst_9 {dimension_numbers = #tpu.dot_dimension_numbers<[1], [0], [0], [1], [0, 0, 1, 1], [], []>} : vector<32x32xbf16>, vector<32x128xbf16>, vector<32x128xf32> -> vector<32x128xf32>
    %c0_10 = arith.constant 0 : index
    %c0_11 = arith.constant 0 : index
    %13 = vector.load %arg5[%c0_10, %c0_11] : memref<1x128xf32, #tpu.memory_space<vmem>>, vector<1x128xf32>
    %14 = vector.broadcast %13 : vector<1x128xf32> to vector<32x128xf32>
    %15 = arith.addf %12, %14 : vector<32x128xf32>
    %c0_12 = arith.constant 0 : index
    %c0_13 = arith.constant 0 : index
    %16 = vector.load %arg6[%c0_12, %c0_13] : memref<32x128xf32, #tpu.memory_space<vmem>>, vector<32x128xf32>
    tpu.vector_store %arg6[%c0_12, %c0_13], %15 {strides = array<i32>} : memref<32x128xf32, #tpu.memory_space<vmem>>, vector<32x128xf32>,
    return
  }
  func.func @transform_0(%arg0: i32) -> (i32, i32) {
    %c0_i32 = arith.constant 0 : i32
    %c0_i32_0 = arith.constant 0 : i32
    %c0_i32_1 = arith.constant 0 : i32
    return %c0_i32, %c0_i32_0 : i32, i32
  }
  func.func @transform_1(%arg0: i32) -> (i32, i32) {
    %c0_i32 = arith.constant 0 : i32
    %c0_i32_0 = arith.constant 0 : i32
    %c0_i32_1 = arith.constant 0 : i32
    return %c0_i32, %c0_i32_0 : i32, i32
  }
  func.func @transform_2(%arg0: i32) -> (i32, i32) {
    %c0_i32 = arith.constant 0 : i32
    %c0_i32_0 = arith.constant 0 : i32
    %c0_i32_1 = arith.constant 0 : i32
    return %c0_i32, %c0_i32_0 : i32, i32
  }
  func.func @transform_3(%arg0: i32) -> (i32, i32) {
    %c0_i32 = arith.constant 0 : i32
    %c0_i32_0 = arith.constant 0 : i32
    %c0_i32_1 = arith.constant 0 : i32
    return %c0_i32, %c0_i32_0 : i32, i32
  }
  func.func @transform_4(%arg0: i32) -> (i32, i32) {
    %c0_i32 = arith.constant 0 : i32
    %c0_i32_0 = arith.constant 0 : i32
    %c0_i32_1 = arith.constant 0 : i32
    return %c0_i32, %c0_i32_0 : i32, i32
  }
  func.func @transform_5(%arg0: i32) -> (i32, i32) {
    %c0_i32 = arith.constant 0 : i32
    %c0_i32_0 = arith.constant 0 : i32
    %c0_i32_1 = arith.constant 0 : i32
    return %c0_i32, %c0_i32_0 : i32, i32
  }
}

</mosaic_0001>

<bundles_post_ra>
// kernel: tpu_custom_call.1
= control target key start
LH: loop header
LB: loop body
LE: loop exit
PB: predicated region body
PF: predicated region fallthrough
CT: control target
= control target key end

     0   :  { %10 = vsyncpa [#allocation3], 0  ;;  %s653_s0 = inlined_call_operand.hbm [shape: bf16[32,32], index: 0, kind: input, shape index: {}]   ;;  %s654_s1 = inlined_call_operand.hbm [shape: bf16[32,128], index: 1, kind: input, shape index: {}]   ;;  %s655_s2 = inlined_call_operand.vmem [shape: f32[1,128], index: 2, kind: input, shape index: {}]   ;;  %s656_s3 = inlined_call_operand.hbm [shape: bf16[128,128], index: 3, kind: input, shape index: {}]   ;;  %s657_s4 = inlined_call_operand.vmem [shape: f32[1,128], index: 4, kind: input, shape index: {}]   ;;  %s658_s5 = inlined_call_operand.hbm [shape: f32[32,128], index: 5, kind: output, shape index: {}]  }
   0x1   :  { %11 = vsyncpa [#allocation6], 0 }
   0x2   :  { %12 = vsyncpa [#allocation4], 0  ;;  %s541_s18 = smov [#allocation5]   ;;  %s542_s20 = smov [#allocation2]  }
   0x3   :  { %s30_s19 = sshll.u32 %s541_s18, 4  ;;  %s18_s21 = sshll.u32 %s542_s20, 4  ;;  %s31_s19 = int_to_ptr.vmem [resolvable:$true] %s30_s19  ;;  %s579_s21 = int_to_ptr.vmem [resolvable:$true] %s18_s21 }
   0x4   :  { %s447_s24 = scalar_lea.hbm %s654_s1, 256 }
   0x5   :  { %p448_p0 = scmp.ne.s32.totalorder %s654_s1, %s447_s24  ;;  %p451_p1 = scmp.lt.u32.totalorder %s447_s24, %s654_s1 }
   0x7   :  { %p453_p2 = pnand %p451_p1, %p448_p0 }
   0x9   :  { %456 = shalt.err (!%p453_p2)
}
   0xa   :  { %s457_s29 = scalar_lea.vmem %s31_s19, 256  ;;  %p462_p4 = scmp.lt.s32.totalorder %s31_s19, %s31_s19 }
   0xb   :  { %p458_p3 = scmp.ne.s32.totalorder %s31_s19, %s457_s29  ;;  %p463_p5 = scmp.lt.s32.totalorder %s457_s29, %s457_s29 }
   0xd   :  { %p464_p6 = por %p463_p5, %p462_p4 }
   0xf   :  { %p465_p7 = pnand %p464_p6, %p458_p3 }
  0x11   :  { %468 = shalt.err (!%p465_p7)
}
  0x12   :  { %s543_s30 = smov 64   ;;  %s544_s6 = smov 4  }
  0x13   :  { %36 = dma.hbm_to_vmem [thread:$0]  %s654_s1, 256, %s31_s19, [#allocation6], %s543_s30, %s543_s30, %s544_s6  }
  0x14   :  { %s469_s11 = scalar_lea.hbm %s653_s0, 256 }
  0x15   :  { %p470_p8 = scmp.ne.s32.totalorder %s653_s0, %s469_s11  ;;  %p473_p9 = scmp.lt.u32.totalorder %s469_s11, %s653_s0 }
  0x17   :  { %p475_p10 = pnand %p473_p9, %p470_p8 }
  0x19   :  { %478 = shalt.err (!%p475_p10)
}
  0x1a   :  { %s479_s16 = scalar_lea.vmem %s579_s21, 256  ;;  %p484_p12 = scmp.lt.s32.totalorder %s579_s21, %s579_s21 }
  0x1b   :  { %p480_p11 = scmp.ne.s32.totalorder %s579_s21, %s479_s16  ;;  %p485_p13 = scmp.lt.s32.totalorder %s479_s16, %s479_s16 }
  0x1d   :  { %p486_p0 = por %p485_p13, %p484_p12 }
  0x1f   :  { %p487_p1 = pnand %p486_p0, %p480_p11 }
  0x21   :  { %490 = shalt.err (!%p487_p1)
}
  0x22   :  { %24 = dma.hbm_to_vmem [thread:$0]  %s653_s0, 256, %s579_s21, [#allocation3], %s543_s30, %s543_s30, %s544_s6  }
  0x23   :  { %s545_s18 = smov [#allocation7]   ;;  %s491_s23 = scalar_lea.hbm %s656_s3, 1024 }
  0x24   :  { %s44_s19 = sshll.u32 %s545_s18, 4  ;;  %p492_p2 = scmp.ne.s32.totalorder %s656_s3, %s491_s23  ;;  %s45_s19 = int_to_ptr.vmem [resolvable:$true] %s44_s19 }
  0x25   :  { %p495_p3 = scmp.lt.u32.totalorder %s491_s23, %s656_s3 }
  0x27   :  { %p497_p4 = pnand %p495_p3, %p492_p2 }
  0x29   :  { %500 = shalt.err (!%p497_p4)
}
  0x2a   :  { %s501_s28 = scalar_lea.vmem %s45_s19, 1024  ;;  %p506_p6 = scmp.lt.s32.totalorder %s45_s19, %s45_s19 }
  0x2b   :  { %p502_p5 = scmp.ne.s32.totalorder %s45_s19, %s501_s28  ;;  %p507_p7 = scmp.lt.s32.totalorder %s501_s28, %s501_s28 }
  0x2d   :  { %p508_p8 = por %p507_p7, %p506_p6 }
  0x2f   :  { %p509_p9 = pnand %p508_p8, %p502_p5 }
  0x31   :  { %512 = shalt.err (!%p509_p9)
}
  0x32   :  { %50 = dma.hbm_to_vmem [thread:$0]  %s656_s3, 1024, %s45_s19, [#allocation6], %s543_s30, %s543_s30, %s544_s6  }
  0x33   :  { %535 = dma.done.wait [#allocation3], 256  }
  0x34   :  { %536 = vsyncadd [#allocation3], 4294967040 }
  0x35   :  { %537 = dma.done.wait [#allocation6], 1280  }
  0x36   :  { %538 = vsyncadd [#allocation6], 4294966016  ;;  %v435_v0 = vld [vmem:[#allocation5] sm:$0xff]   ;;  %v436_v1 = vld [vmem:[#allocation5 + $0x8] sm:$0xff]   ;;  %vm100_vm0 = vcmask 261120   ;;  %s546_s6 = smov [#allocation8]  }
  0x37   :  { %391 = vmatprep.subr.bf16.mxu0 %v435_v0  ;;  %v437_v2 = vld [vmem:[#allocation2] sm:$0xff]   ;;  %v440_v4 = vld [vmem:[#allocation7 + $0x8] sm:$0xff]   ;;  %v441_v6 = vld [vmem:[#allocation7 + $0x10] sm:$0xff]   ;;  %s342_s7 = sshll.u32 %s546_s6, 4  ;;  %s343_s7 = int_to_ptr.vmem [resolvable:$true] %s342_s7 }
  0x38   :  { %392 = vmatpush3.bf16.msra.mxu0 %v435_v0  ;;  %395 = vmatprep.mubr.msk.bf16.mxu0 %vm100_vm0, %v437_v2  ;;  %v439_v3 = vld [vmem:[#allocation7] sm:$0xff]   ;;  %v438_v5 = vld [vmem:[#allocation2 + $0x8] sm:$0xff]   ;;  %v442_v7 = vld [vmem:[#allocation7 + $0x18] sm:$0xff]   ;;  %s513_s8 = scalar_lea.vmem %s343_s7, 512  ;;  %p518_p11 = scmp.lt.s32.totalorder %s343_s7, %s343_s7 }
  0x39   :  { %393 = vmatprep.subr.bf16.mxu0 %v436_v1  ;;  %399 = vmatprep.subr.bf16.mxu1 %v439_v3  ;;  %v443_v8 = vld [vmem:[#allocation7 + $0x20] sm:$0xff]   ;;  %v444_v9 = vld [vmem:[#allocation7 + $0x28] sm:$0xff]   ;;  %v445_v10 = vld [vmem:[#allocation7 + $0x30] sm:$0xff]   ;;  %p514_p10 = scmp.ne.s32.totalorder %s343_s7, %s513_s8  ;;  %p519_p12 = scmp.lt.s32.totalorder %s513_s8, %s513_s8 }
  0x3a   :  { %400 = vmatpush3.bf16.msra.mxu1 %v439_v3  ;;  %v446_v11 = vld [vmem:[#allocation7 + $0x38] sm:$0xff]   ;;  %v355_v12 = vld [vmem:[%s655_s2] ss:$0 sm:$0xff] }
  0x3b   :  { %401 = vmatprep.subr.bf16.mxu1 %v440_v4  ;;  %v370_v33 = vld [vmem:[%s657_s4] ss:$0 sm:$0xff]  ;;  %p520_p13 = por %p519_p12, %p518_p11 }
  0x3c   :  { %394 = vmatpush3.bf16.msra.mxu0 %v436_v1 }
  0x3d   :  { %p521_p0 = pnand %p520_p13, %p514_p10 }
  0x3e   :  { %402 = vmatpush3.bf16.msra.mxu1 %v440_v4 }
  0x3f   :  { %396 = vmatmul.mubr.msk.bf16.vlgmr.msra.gmra.mrb[0].mxu0 %vm100_vm0, %v438_v5  ;;  %403 = vmatprep.subr.bf16.mxu1 %v441_v6 }
  0x40   :  { %423 = vmatprep.mubr.msk.bf16.mxu0 %vm100_vm0, %v437_v2 }
  0x42   :  { %404 = vmatpush3.bf16.msra.mxu1 %v441_v6 }
  0x43   :  { %405 = vmatprep.subr.bf16.mxu1 %v442_v7 }
  0x46   :  { %406 = vmatpush3.bf16.msra.mxu1 %v442_v7 }
  0x47   :  { %407 = vmatprep.subr.bf16.mxu1 %v443_v8 }
  0x4a   :  { %408 = vmatpush3.bf16.msra.mxu1 %v443_v8 }
  0x4b   :  { %409 = vmatprep.subr.bf16.mxu1 %v444_v9 }
  0x4e   :  { %410 = vmatpush3.bf16.msra.mxu1 %v444_v9 }
  0x4f   :  { %411 = vmatprep.subr.bf16.mxu1 %v445_v10 }
  0x52   :  { %412 = vmatpush3.bf16.msra.mxu1 %v445_v10 }
  0x53   :  { %413 = vmatprep.subr.bf16.mxu1 %v446_v11 }
  0x56   :  { %414 = vmatpush3.bf16.msra.mxu1 %v446_v11 }
 0x112   :  { %v397_v13 = vpop.f32.mrb[0].mxu0 }
 0x113   :  { %v150_v14 = vadd.f32 %v397_v13, %v355_v12  ;;  %v141_v15 = vpop.f32.mrb[1].mxu0 }
 0x114   :  { %v142_v16 = vadd.f32 %v355_v12, %v141_v15  ;;  %v398_v17 = vpop.f32.mrb[2].mxu0 }
 0x115   :  { %v153_v18 = vadd.f32 %v398_v17, %v355_v12  ;;  %v144_v19 = vpop.f32.mrb[3].mxu0  ;;  %v158_v21 = vmax.f32 %v150_v14, 0.0 }
 0x116   :  { %v145_v20 = vadd.f32 %v355_v12, %v144_v19  ;;  %v156_v23 = vmax.f32 %v142_v16, 0.0 }
 0x117   :  { %v159_v22 = vmax.f32 %v153_v18, 0.0 }
 0x118   :  { %v157_v24 = vmax.f32 %v145_v20, 0.0 }
 0x119   :  { %v161_v25 = vpack.c.bf16 %v159_v22, %v158_v21 }
 0x11a   :  { %v160_v26 = vpack.c.bf16 %v157_v24, %v156_v23 }
 0x11c   :  { %415 = vmatprep.mubr.bf16.mxu1 %v160_v26 }
 0x11d   :  { %416 = vmatmul.mubr.bf16.vlgmr.msra.gmra.mrb[0].mxu1 %v161_v25 }
 0x1f0   :  { %v417_v27 = vpop.f32.mrb[0].mxu1 }
 0x1f1   :  { %v260_v28 = vpop.f32.mrb[1].mxu1 }
 0x1f2   :  { %v418_v29 = vpop.f32.mrb[2].mxu1 }
 0x1f3   :  { %v276_v30 = vpack.c.bf16 %v418_v29, %v417_v27  ;;  %v263_v31 = vpop.f32.mrb[3].mxu1 }
 0x1f4   :  { %v275_v32 = vpack.c.bf16 %v263_v31, %v260_v28 }
 0x1f6   :  { %419 = vmatprep.subr.bf16.mxu0 %v275_v32 }
 0x1f7   :  { %420 = vmatpush3.bf16.msra.mxu0 %v275_v32 }
 0x1f8   :  { %421 = vmatprep.subr.bf16.mxu0 %v276_v30 }
 0x1fb   :  { %422 = vmatpush3.bf16.msra.mxu0 %v276_v30 }
 0x1fe   :  { %424 = vmatmul.mubr.msk.bf16.vlgmr.msra.gmra.mrb[4].mxu0 %vm100_vm0, %v438_v5 }
 0x2d1   :  { %v425_v34 = vpop.f32.mrb[4].mxu0 }
 0x2d2   :  { %v327_v35 = vadd.f32 %v425_v34, %v370_v33  ;;  %v318_v36 = vpop.f32.mrb[5].mxu0 }
 0x2d3   :  { %v319_v37 = vadd.f32 %v370_v33, %v318_v36  ;;  %v426_v38 = vpop.f32.mrb[6].mxu0 }
 0x2d4   :  { %335 = vst [vmem:[#allocation8 + $0x10] sm:$0xff] %v327_v35  ;;  %v330_v39 = vadd.f32 %v426_v38, %v370_v33  ;;  %v321_v40 = vpop.f32.mrb[7].mxu0 }
 0x2d5   :  { %333 = vst [vmem:[#allocation8] sm:$0xff] %v319_v37  ;;  %v322_v41 = vadd.f32 %v370_v33, %v321_v40 }
 0x2d6   :  { %336 = vst [vmem:[#allocation8 + $0x18] sm:$0xff] %v330_v39 }
 0x2d7   :  { %334 = vst [vmem:[#allocation8 + $0x8] sm:$0xff] %v322_v41 }
 0x2d8   :  { %524 = shalt.err (!%p521_p0)
}
 0x2d9   :  { %s525_s10 = scalar_lea.hbm %s658_s5, 512 }
 0x2da   :  { %p526_p1 = scmp.ne.s32.totalorder %s658_s5, %s525_s10  ;;  %p529_p2 = scmp.lt.u32.totalorder %s525_s10, %s658_s5 }
 0x2dc   :  { %p531_p3 = pnand %p529_p2, %p526_p1 }
 0x2de   :  { %534 = shalt.err (!%p531_p3)
}
 0x2df   :  { %s547_s15 = smov 128   ;;  %s548_s16 = smov 8  }
 0x2e0   :  { %348 = dma.vmem_to_hbm [thread:$0]  %s343_s7, 512, %s658_s5, [#allocation4], %s547_s15, %s547_s15, %s548_s16  }
 0x2e1   :  { %539 = dma.done.wait [#allocation4], 512  }
 0x2e2   :  { %540 = vsyncadd [#allocation4], 4294966784 }
 0x2e3   :  { %352 = vsyncpa [#allocation3], 1 }
 0x2e4   :  { %353 = vsyncpa [#allocation6], 1 }
 0x2e5   :  { %354 = vsyncpa [#allocation4], 1 }

</bundles_post_ra>
